<compile_context>
chip_gen: v6e
topology: v6e:2x2x1
jax: 0.10.0
libtpu: 0.0.40
codegen_flags: <defaults>
</compile_context>

<pallas_src>
import numpy as np
import jax
import jax.numpy as jnp
from jax.experimental import pallas as pl
from jax.experimental.pallas import tpu as pltpu


def _round_up(a, b):
    return (a + b - 1) // b * b


# ----------------------------------------------------------------------------
# Parameter setup glue: lower conv / conv-transpose to exact structured matrices
# ----------------------------------------------------------------------------
def conv1d_as_matrix(W, b, L_in, stride, pad):
    """W: (C_out, C_in, K) Conv1d weight -> (C_in*L_in, C_out*L_out) matrix, bias (C_out*L_out,)."""
    C_out, C_in, K = W.shape
    L_out = (L_in + 2 * pad - K) // stride + 1
    M = np.zeros((C_in * L_in, C_out * L_out), dtype=np.float32)
    for co in range(C_out):
        for ci in range(C_in):
            for t in range(L_out):
                for k in range(K):
                    i = t * stride + k - pad
                    if 0 <= i < L_in:
                        M[ci * L_in + i, co * L_out + t] += W[co, ci, k]
    bvec = np.repeat(np.asarray(b, np.float32), L_out)
    return M, bvec, L_out


def convtranspose1d_as_matrix(W, b, L_in, stride, pad, output_padding):
    """W: (C_in, C_out, K) ConvTranspose1d weight -> matrix, bias vector."""
    C_in, C_out, K = W.shape
    L_out = (L_in - 1) * stride - 2 * pad + K + output_padding
    M = np.zeros((C_in * L_in, C_out * L_out), dtype=np.float32)
    for ci in range(C_in):
        for co in range(C_out):
            for t in range(L_in):
                for k in range(K):
                    j = t * stride + k - pad
                    if 0 <= j < L_out:
                        M[ci * L_in + t, co * L_out + j] += W[ci, co, k]
    bvec = np.repeat(np.asarray(b, np.float32), L_out)
    return M, bvec, L_out


def prepare_params(W1, b1, W2, b2, Wd1, bd1, Wd2, bd2, L_in, compute_dtype=jnp.bfloat16):
    """Build the 4 structured matrices (compute_dtype) and 4 f32 bias rows at native widths.

    For L_in=16 the feature widths are exactly 16 -> 128 -> 16 -> 128 -> 16, so every matmul
    operand is either lane-dense (128) or equal to the full array dim (legal BlockSpec).
    """
    M1, bv1, L1 = conv1d_as_matrix(W1, b1, L_in, stride=2, pad=1)        # 1x16  -> 16x8
    M2, bv2, L2 = conv1d_as_matrix(W2, b2, L1, stride=2, pad=1)          # 16x8  -> 4x4
    M3, bv3, L3 = convtranspose1d_as_matrix(Wd1, bd1, L2, 2, 1, 1)       # 4x4   -> 16x8
    M4, bv4, L4 = convtranspose1d_as_matrix(Wd2, bd2, L3, 2, 1, 1)       # 16x8  -> 1x16

    def mat(m):
        return jnp.asarray(m, compute_dtype)

    def brow(bv):
        return jnp.asarray(bv.reshape(1, -1), jnp.float32)

    mats = (mat(M1), brow(bv1), mat(M2), brow(bv2),
            mat(M3), brow(bv3), mat(M4), brow(bv4))
    return {"mats": mats, "f_in": M1.shape[0], "f_out": M4.shape[1], "l_out": L4}


# ----------------------------------------------------------------------------
# Pallas kernel: full encoder+decoder hot path (4 matmuls + f32 bias + ReLU + Sigmoid)
# ----------------------------------------------------------------------------
def _make_cae_kernel(approx_sigmoid):
    def kernel(x_ref, m1_ref, b1_ref, m2_ref, b2_ref, m3_ref, b3_ref, m4_ref, b4_ref, o_ref):
        cdt = m1_ref.dtype  # matmul operand dtype (bf16 fast path or f32 reference path)
        # encoder: Conv1d(1,16,3,s2,p1)+ReLU ; Conv1d(16,4,3,s2,p1)+ReLU
        h = jnp.maximum(
            jnp.dot(x_ref[...], m1_ref[...], preferred_element_type=jnp.float32)
            + b1_ref[...], 0.0)                                           # (bt, 128) f32
        h = jnp.maximum(
            jnp.dot(h.astype(cdt), m2_ref[...], preferred_element_type=jnp.float32)
            + b2_ref[...], 0.0)                                           # (bt, 16)  f32
        # decoder: ConvT(4,16,3,s2,p1,op1)+ReLU ; ConvT(16,1,3,s2,p1,op1)+Sigmoid
        h = jnp.maximum(
            jnp.dot(h.astype(cdt), m3_ref[...], preferred_element_type=jnp.float32)
            + b3_ref[...], 0.0)                                           # (bt, 128) f32
        z = (jnp.dot(h.astype(cdt), m4_ref[...], preferred_element_type=jnp.float32)
             + b4_ref[...])                                               # (bt, 16)  f32
        # sigmoid: exp + reciprocal both run on the EUP slot.
        if approx_sigmoid:
            s = pl.reciprocal(1.0 + jnp.exp(-z), approx=True)
        else:
            s = 1.0 / (1.0 + jnp.exp(-z))
        o_ref[...] = s.astype(o_ref.dtype)
    return kernel


def conv_autoencoder_forward(x, params, *, batch_tile=4096, out_dtype=None,
                             approx_sigmoid=None):
    """x: (B, 1, L) float32, NCL like PyTorch. Returns (B, 1, L_out) in out_dtype."""
    B, C, L = x.shape
    assert C == 1
    M1, b1r, M2, b2r, M3, b3r, M4, b4r = params["mats"]
    f_in, f_out, l_out = params["f_in"], params["f_out"], params["l_out"]
    assert f_in == C * L
    cdt = M1.dtype
    if out_dtype is None:
        out_dtype = cdt
    if approx_sigmoid is None:
        approx_sigmoid = (jnp.dtype(out_dtype) == jnp.dtype(jnp.bfloat16))

    # Batch tiling: large tiles (amortize ~0.35us per grid step), multiple of 8, and at
    # least two grid steps whenever the batch allows so the v7x megacore can shard the
    # "parallel" batch axis across both TensorCores.
    b8 = _round_up(B, 8)
    bt_cap = max(8, _round_up(batch_tile, 8))
    grid_n = pl.cdiv(b8, bt_cap)
    if grid_n < 2 and b8 > 8:
        grid_n = 2
    bt = _round_up(pl.cdiv(b8, grid_n), 8)
    b_pad = bt * grid_n

    # Narrow (b_pad, f_in) input in the compute dtype — no 128-lane padding in the wrapper.
    x2d = x.reshape(B, f_in).astype(cdt)
    if b_pad != B:
        x2d = jnp.pad(x2d, ((0, b_pad - B), (0, 0)))

    flops = 2 * b_pad * sum(int(m.shape[0]) * int(m.shape[1]) for m in (M1, M2, M3, M4))
    bytes_accessed = (int(x2d.size) * x2d.dtype.itemsize
                      + b_pad * f_out * jnp.dtype(out_dtype).itemsize
                      + sum(int(a.size) * a.dtype.itemsize for a in params["mats"]))
    cost = pl.CostEstimate(flops=flops, transcendentals=2 * b_pad * f_out,
                           bytes_accessed=bytes_accessed)

    out2d = pl.pallas_call(
        _make_cae_kernel(approx_sigmoid),
        out_shape=jax.ShapeDtypeStruct((b_pad, f_out), out_dtype),
        grid=(grid_n,),
        in_specs=[
            pl.BlockSpec((bt, f_in), lambda i: (i, 0)),   # x : narrow, tiled over batch
            pl.BlockSpec(M1.shape, lambda i: (0, 0)),     # M1 (16, 128)  resident
            pl.BlockSpec(b1r.shape, lambda i: (0, 0)),    # b1 (1, 128)   f32
            pl.BlockSpec(M2.shape, lambda i: (0, 0)),     # M2 (128, 16)
            pl.BlockSpec(b2r.shape, lambda i: (0, 0)),    # b2 (1, 16)
            pl.BlockSpec(M3.shape, lambda i: (0, 0)),     # M3 (16, 128)
            pl.BlockSpec(b3r.shape, lambda i: (0, 0)),    # b3 (1, 128)
            pl.BlockSpec(M4.shape, lambda i: (0, 0)),     # M4 (128, 16)
            pl.BlockSpec(b4r.shape, lambda i: (0, 0)),    # b4 (1, 16)
        ],
        out_specs=pl.BlockSpec((bt, f_out), lambda i: (i, 0)),
        compiler_params=pltpu.CompilerParams(
            dimension_semantics=("parallel",),            # batch grid axis: megacore-shardable
            vmem_limit_bytes=32 * 1024 * 1024),           # lift v5e's 16 MiB scoped default
        cost_estimate=cost,
    )(x2d, M1, b1r, M2, b2r, M3, b3r, M4, b4r)

    return out2d[:B].reshape(B, 1, l_out)


# ----------------------------------------------------------------------------
# Pure numpy reference (direct conv loops) for correctness checking
# ----------------------------------------------------------------------------
def ref_forward_np(x, W1, b1, W2, b2, Wd1, bd1, Wd2, bd2):
    def conv1d(x, W, b, stride, pad):
        B, C_in, L_in = x.shape
        C_out, _, K = W.shape
        L_out = (L_in + 2 * pad - K) // stride + 1
        xp = np.zeros((B, C_in, L_in + 2 * pad), np.float32)
        xp[:, :, pad:pad + L_in] = x
        y = np.zeros((B, C_out, L_out), np.float32)
        for t in range(L_out):
            patch = xp[:, :, t * stride:t * stride + K]
            y[:, :, t] = np.einsum('bck,ock->bo', patch, W) + b
        return y

    def deconv1d(x, W, b, stride, pad, op):
        B, C_in, L_in = x.shape
        _, C_out, K = W.shape
        L_out = (L_in - 1) * stride - 2 * pad + K + op
        y = np.zeros((B, C_out, L_out), np.float32)
        for t in range(L_in):
            for k in range(K):
                j = t * stride + k - pad
                if 0 <= j < L_out:
                    y[:, :, j] += np.einsum('bc,co->bo', x[:, :, t], W[:, :, k])
        return y + b[None, :, None]

    h = np.maximum(conv1d(x, W1, b1, 2, 1), 0.0)
    h = np.maximum(conv1d(h, W2, b2, 2, 1), 0.0)
    h = np.maximum(deconv1d(h, Wd1, bd1, 2, 1, 1), 0.0)
    z = deconv1d(h, Wd2, bd2, 2, 1, 1)
    return 1.0 / (1.0 + np.exp(-z))


if __name__ == "__main__":
    key = jax.random.PRNGKey(0)
    kx, kx2, k1, k2, k3, k4, k5, k6, k7, k8 = jax.random.split(key, 10)

    B, L = 2, 16  # input is NCL: (batch, 1 channel, length 16)
    x = jax.random.uniform(kx, (B, 1, L), jnp.float32)

    def uni(k, shape, fan):
        bound = 1.0 / np.sqrt(fan)
        return jax.random.uniform(k, shape, jnp.float32, -bound, bound)

    # Deterministic synthetic init (PyTorch-like uniform bounds).
    W1 = uni(k1, (16, 1, 3), 1 * 3);   b1 = uni(k2, (16,), 1 * 3)    # Conv1d(1,16,3)
    W2 = uni(k3, (4, 16, 3), 16 * 3);  b2 = uni(k4, (4,), 16 * 3)    # Conv1d(16,4,3)
    Wd1 = uni(k5, (4, 16, 3), 16 * 3); bd1 = uni(k6, (16,), 16 * 3)  # ConvT(4,16,3)
    Wd2 = uni(k7, (16, 1, 3), 1 * 3);  bd2 = uni(k8, (1,), 1 * 3)    # ConvT(16,1,3)

    (W1n, b1n, W2n, b2n, Wd1n, bd1n, Wd2n, bd2n) = map(
        np.asarray, (W1, b1, W2, b2, Wd1, bd1, Wd2, bd2))

    y_ref = ref_forward_np(np.asarray(x), W1n, b1n, W2n, b2n, Wd1n, bd1n, Wd2n, bd2n)

    # f32 verification path: f32 matmul operands, f32 output, exact sigmoid reciprocal.
    params_f32 = prepare_params(W1n, b1n, W2n, b2n, Wd1n, bd1n, Wd2n, bd2n, L,
                                compute_dtype=jnp.float32)
    y32 = jax.block_until_ready(
        conv_autoencoder_forward(x, params_f32, out_dtype=jnp.float32))
    assert y32.shape == (B, 1, L), y32.shape
    np.testing.assert_allclose(np.asarray(y32), y_ref, rtol=1e-2, atol=1e-2)

    # bf16 fast path: bf16 operands + bf16 output (f32 MXU accumulation, approx reciprocal).
    params_bf16 = prepare_params(W1n, b1n, W2n, b2n, Wd1n, bd1n, Wd2n, bd2n, L,
                                 compute_dtype=jnp.bfloat16)
    y16 = jax.block_until_ready(conv_autoencoder_forward(x, params_bf16))
    assert y16.shape == (B, 1, L), y16.shape
    np.testing.assert_allclose(np.asarray(y16.astype(jnp.float32)), y_ref,
                               rtol=5e-2, atol=3e-2)

    # Larger batch: exercises the >=2-step grid (v7x megacore path) + batch padding.
    Bb = 300
    xb = jax.random.uniform(kx2, (Bb, 1, L), jnp.float32)
    yb_ref = ref_forward_np(np.asarray(xb), W1n, b1n, W2n, b2n, Wd1n, bd1n, Wd2n, bd2n)
    yb = jax.block_until_ready(conv_autoencoder_forward(xb, params_bf16))
    assert yb.shape == (Bb, 1, L), yb.shape
    np.testing.assert_allclose(np.asarray(yb.astype(jnp.float32)), yb_ref,
                               rtol=5e-2, atol=3e-2)

    print("KERNEL_OK")
</pallas_src>

<mosaic_0001>
module attributes {stable_mosaic.version = 11 : i64} {
  func.func @kernel(%arg0: i32, %arg1: memref<8x16xf32, #tpu.memory_space<vmem>>, %arg2: memref<16x128xf32, #tpu.memory_space<vmem>>, %arg3: memref<1x128xf32, #tpu.memory_space<vmem>>, %arg4: memref<128x16xf32, #tpu.memory_space<vmem>>, %arg5: memref<1x16xf32, #tpu.memory_space<vmem>>, %arg6: memref<16x128xf32, #tpu.memory_space<vmem>>, %arg7: memref<1x128xf32, #tpu.memory_space<vmem>>, %arg8: memref<128x16xf32, #tpu.memory_space<vmem>>, %arg9: memref<1x16xf32, #tpu.memory_space<vmem>>, %arg10: memref<8x16xf32, #tpu.memory_space<vmem>>) attributes {dimension_semantics = [#tpu.dimension_semantics<parallel>], iteration_bounds = array<i64: 1>, scalar_prefetch = 0 : i64, scratch_operands = 0 : i64, tpu.core_type = #tpu.core_type<tc>, window_params = [{transform_indices = @transform_0, window_bounds = array<i64: 8, 16>}, {pipeline_mode = #tpu.pipeline_mode<synchronous>, transform_indices = @transform_1, window_bounds = array<i64: 16, 128>}, {pipeline_mode = #tpu.pipeline_mode<synchronous>, transform_indices = @transform_2, window_bounds = array<i64: 1, 128>}, {pipeline_mode = #tpu.pipeline_mode<synchronous>, transform_indices = @transform_3, window_bounds = array<i64: 128, 16>}, {pipeline_mode = #tpu.pipeline_mode<synchronous>, transform_indices = @transform_4, window_bounds = array<i64: 1, 16>}, {pipeline_mode = #tpu.pipeline_mode<synchronous>, transform_indices = @transform_5, window_bounds = array<i64: 16, 128>}, {pipeline_mode = #tpu.pipeline_mode<synchronous>, transform_indices = @transform_6, window_bounds = array<i64: 1, 128>}, {pipeline_mode = #tpu.pipeline_mode<synchronous>, transform_indices = @transform_7, window_bounds = array<i64: 128, 16>}, {pipeline_mode = #tpu.pipeline_mode<synchronous>, transform_indices = @transform_8, window_bounds = array<i64: 1, 16>}, {transform_indices = @transform_9, window_bounds = array<i64: 8, 16>}]} {
    %c0 = arith.constant 0 : index
    %c0_0 = arith.constant 0 : index
    %0 = vector.load %arg1[%c0, %c0_0] : memref<8x16xf32, #tpu.memory_space<vmem>>, vector<8x16xf32>
    %c0_1 = arith.constant 0 : index
    %c0_2 = arith.constant 0 : index
    %1 = vector.load %arg2[%c0_1, %c0_2] : memref<16x128xf32, #tpu.memory_space<vmem>>, vector<16x128xf32>
    %cst = arith.constant dense<0.000000e+00> : vector<8x128xf32>
    %2 = tpu.matmul %0, %1, %cst {dimension_numbers = #tpu.dot_dimension_numbers<[1], [0], [0], [1], [0, 0, 1, 1], [], []>} : vector<8x16xf32>, vector<16x128xf32>, vector<8x128xf32> -> vector<8x128xf32>
    %c0_3 = arith.constant 0 : index
    %c0_4 = arith.constant 0 : index
    %3 = vector.load %arg3[%c0_3, %c0_4] : memref<1x128xf32, #tpu.memory_space<vmem>>, vector<1x128xf32>
    %4 = vector.broadcast %3 : vector<1x128xf32> to vector<8x128xf32>
    %5 = arith.addf %2, %4 : vector<8x128xf32>
    %cst_5 = arith.constant 0.000000e+00 : f32
    %6 = vector.broadcast %cst_5 : f32 to vector<8x128xf32>
    %7 = arith.maximumf %5, %6 : vector<8x128xf32>
    %c0_6 = arith.constant 0 : index
    %c0_7 = arith.constant 0 : index
    %8 = vector.load %arg4[%c0_6, %c0_7] : memref<128x16xf32, #tpu.memory_space<vmem>>, vector<128x16xf32>
    %cst_8 = arith.constant dense<0.000000e+00> : vector<8x16xf32>
    %9 = tpu.matmul %7, %8, %cst_8 {dimension_numbers = #tpu.dot_dimension_numbers<[1], [0], [0], [1], [0, 0, 1, 1], [], []>} : vector<8x128xf32>, vector<128x16xf32>, vector<8x16xf32> -> vector<8x16xf32>
    %c0_9 = arith.constant 0 : index
    %c0_10 = arith.constant 0 : index
    %10 = vector.load %arg5[%c0_9, %c0_10] : memref<1x16xf32, #tpu.memory_space<vmem>>, vector<1x16xf32>
    %11 = vector.broadcast %10 : vector<1x16xf32> to vector<8x16xf32>
    %12 = arith.addf %9, %11 : vector<8x16xf32>
    %cst_11 = arith.constant 0.000000e+00 : f32
    %13 = vector.broadcast %cst_11 : f32 to vector<8x16xf32>
    %14 = arith.maximumf %12, %13 : vector<8x16xf32>
    %c0_12 = arith.constant 0 : index
    %c0_13 = arith.constant 0 : index
    %15 = vector.load %arg6[%c0_12, %c0_13] : memref<16x128xf32, #tpu.memory_space<vmem>>, vector<16x128xf32>
    %cst_14 = arith.constant dense<0.000000e+00> : vector<8x128xf32>
    %16 = tpu.matmul %14, %15, %cst_14 {dimension_numbers = #tpu.dot_dimension_numbers<[1], [0], [0], [1], [0, 0, 1, 1], [], []>} : vector<8x16xf32>, vector<16x128xf32>, vector<8x128xf32> -> vector<8x128xf32>
    %c0_15 = arith.constant 0 : index
    %c0_16 = arith.constant 0 : index
    %17 = vector.load %arg7[%c0_15, %c0_16] : memref<1x128xf32, #tpu.memory_space<vmem>>, vector<1x128xf32>
    %18 = vector.broadcast %17 : vector<1x128xf32> to vector<8x128xf32>
    %19 = arith.addf %16, %18 : vector<8x128xf32>
    %cst_17 = arith.constant 0.000000e+00 : f32
    %20 = vector.broadcast %cst_17 : f32 to vector<8x128xf32>
    %21 = arith.maximumf %19, %20 : vector<8x128xf32>
    %c0_18 = arith.constant 0 : index
    %c0_19 = arith.constant 0 : index
    %22 = vector.load %arg8[%c0_18, %c0_19] : memref<128x16xf32, #tpu.memory_space<vmem>>, vector<128x16xf32>
    %cst_20 = arith.constant dense<0.000000e+00> : vector<8x16xf32>
    %23 = tpu.matmul %21, %22, %cst_20 {dimension_numbers = #tpu.dot_dimension_numbers<[1], [0], [0], [1], [0, 0, 1, 1], [], []>} : vector<8x128xf32>, vector<128x16xf32>, vector<8x16xf32> -> vector<8x16xf32>
    %c0_21 = arith.constant 0 : index
    %c0_22 = arith.constant 0 : index
    %24 = vector.load %arg9[%c0_21, %c0_22] : memref<1x16xf32, #tpu.memory_space<vmem>>, vector<1x16xf32>
    %25 = vector.broadcast %24 : vector<1x16xf32> to vector<8x16xf32>
    %26 = arith.addf %23, %25 : vector<8x16xf32>
    %cst_23 = arith.constant 0.000000e+00 : f32
    %27 = vector.broadcast %cst_23 : f32 to vector<8x16xf32>
    %28 = arith.subf %27, %26 : vector<8x16xf32>
    %29 = math.exp %28 : vector<8x16xf32>
    %cst_24 = arith.constant 1.000000e+00 : f32
    %30 = vector.broadcast %cst_24 : f32 to vector<8x16xf32>
    %31 = arith.addf %30, %29 : vector<8x16xf32>
    %cst_25 = arith.constant 1.000000e+00 : f32
    %32 = vector.broadcast %cst_25 : f32 to vector<8x16xf32>
    %33 = arith.divf %32, %31 : vector<8x16xf32>
    %c0_26 = arith.constant 0 : index
    %c0_27 = arith.constant 0 : index
    %34 = vector.load %arg10[%c0_26, %c0_27] : memref<8x16xf32, #tpu.memory_space<vmem>>, vector<8x16xf32>
    tpu.vector_store %arg10[%c0_26, %c0_27], %33 {strides = array<i32>} : memref<8x16xf32, #tpu.memory_space<vmem>>, vector<8x16xf32>,
    return
  }
  func.func @transform_0(%arg0: i32) -> (i32, i32) {
    %c0_i32 = arith.constant 0 : i32
    %c0_i32_0 = arith.constant 0 : i32
    return %arg0, %c0_i32 : i32, i32
  }
  func.func @transform_1(%arg0: i32) -> (i32, i32) {
    %c0_i32 = arith.constant 0 : i32
    %c0_i32_0 = arith.constant 0 : i32
    %c0_i32_1 = arith.constant 0 : i32
    return %c0_i32, %c0_i32_0 : i32, i32
  }
  func.func @transform_2(%arg0: i32) -> (i32, i32) {
    %c0_i32 = arith.constant 0 : i32
    %c0_i32_0 = arith.constant 0 : i32
    %c0_i32_1 = arith.constant 0 : i32
    return %c0_i32, %c0_i32_0 : i32, i32
  }
  func.func @transform_3(%arg0: i32) -> (i32, i32) {
    %c0_i32 = arith.constant 0 : i32
    %c0_i32_0 = arith.constant 0 : i32
    %c0_i32_1 = arith.constant 0 : i32
    return %c0_i32, %c0_i32_0 : i32, i32
  }
  func.func @transform_4(%arg0: i32) -> (i32, i32) {
    %c0_i32 = arith.constant 0 : i32
    %c0_i32_0 = arith.constant 0 : i32
    %c0_i32_1 = arith.constant 0 : i32
    return %c0_i32, %c0_i32_0 : i32, i32
  }
  func.func @transform_5(%arg0: i32) -> (i32, i32) {
    %c0_i32 = arith.constant 0 : i32
    %c0_i32_0 = arith.constant 0 : i32
    %c0_i32_1 = arith.constant 0 : i32
    return %c0_i32, %c0_i32_0 : i32, i32
  }
  func.func @transform_6(%arg0: i32) -> (i32, i32) {
    %c0_i32 = arith.constant 0 : i32
    %c0_i32_0 = arith.constant 0 : i32
    %c0_i32_1 = arith.constant 0 : i32
    return %c0_i32, %c0_i32_0 : i32, i32
  }
  func.func @transform_7(%arg0: i32) -> (i32, i32) {
    %c0_i32 = arith.constant 0 : i32
    %c0_i32_0 = arith.constant 0 : i32
    %c0_i32_1 = arith.constant 0 : i32
    return %c0_i32, %c0_i32_0 : i32, i32
  }
  func.func @transform_8(%arg0: i32) -> (i32, i32) {
    %c0_i32 = arith.constant 0 : i32
    %c0_i32_0 = arith.constant 0 : i32
    %c0_i32_1 = arith.constant 0 : i32
    return %c0_i32, %c0_i32_0 : i32, i32
  }
  func.func @transform_9(%arg0: i32) -> (i32, i32) {
    %c0_i32 = arith.constant 0 : i32
    %c0_i32_0 = arith.constant 0 : i32
    return %arg0, %c0_i32 : i32, i32
  }
}

</mosaic_0001>

<bundles_post_ra>
// kernel: tpu_custom_call.1
= control target key start
LH: loop header
LB: loop body
LE: loop exit
PB: predicated region body
PF: predicated region fallthrough
CT: control target
= control target key end

     0   :  { %v568_v1 = vmov 0.0   ;;  %vm569_vm0 = vmmov 0   ;;  %vm43_vm1 = vcmask 130048   ;;  %s794_s0 = inlined_call_operand.vmem [shape: f32[8,16], index: 0, kind: input, shape index: {}]   ;;  %s795_s1 = inlined_call_operand.vmem [shape: f32[16,128], index: 1, kind: input, shape index: {}]   ;;  %s796_s2 = inlined_call_operand.vmem [shape: f32[1,128], index: 2, kind: input, shape index: {}]   ;;  %s797_s3 = inlined_call_operand.vmem [shape: f32[128,16], index: 3, kind: input, shape index: {}]   ;;  %s798_s4 = inlined_call_operand.vmem [shape: f32[1,16], index: 4, kind: input, shape index: {}]   ;;  %s799_s5 = inlined_call_operand.vmem [shape: f32[16,128], index: 5, kind: input, shape index: {}]   ;;  %s800_s6 = inlined_call_operand.vmem [shape: f32[1,128], index: 6, kind: input, shape index: {}]   ;;  %s801_s7 = inlined_call_operand.vmem [shape: f32[128,16], index: 7, kind: input, shape index: {}]   ;;  %s802_s8 = inlined_call_operand.vmem [shape: f32[1,16], index: 8, kind: input, shape index: {}]   ;;  %s803_s9 = inlined_call_operand.hbm [shape: f32[8,16], index: 9, kind: output, shape index: {}]  }
   0x1   :  { %v35_v0 = vld [vmem:[%s795_s1 + $0x8] sm:$0xff]  ;;  %455 = vmatprep.subr.mxu1 %v568_v1  ;;  %v34_v2 = vld [vmem:[%s795_s1] sm:$0xff]  ;;  %459 = vmatprep.mubr.msk.f32.mxu1 %vm569_vm0, %v568_v1  ;;  %v133_v4 = vld [vmem:[%s797_s3 + $0x78] sm:$0xff] }
   0x2   :  { %456 = vmatpush3.msra.mxu1 %v35_v0  ;;  %v33_v3 = vld [vmem:[%s794_s0] sm:$0xff]  ;;  %497 = vmatprep.subr.mxu0 %v568_v1  ;;  %v132_v5 = vld [vmem:[%s797_s3 + $0x70] sm:$0xff] }
   0x3   :  { %457 = vmatprep.subr.mxu1 %v568_v1  ;;  %501 = vmatprep.mubr.msk.f32.mxu0 %vm569_vm0, %v568_v1 }
   0x4   :  { %458 = vmatpush3.msra.mxu1 %v34_v2 }
   0x5   :  { %460 = vmatmul.mubr.msk.f32.vlgmr.msra.gmra.mxu1 %vm43_vm1, %v33_v3  ;;  %462 = vmatprep.subr.mxu1 %v568_v1 }
   0x6   :  { %14 = vsyncpa [#allocation3], 0  ;;  %463 = vmatpush3.msra.mxu1 %v133_v4  ;;  %494 = vmatprep.mubr.msk.f32.mxu1 %vm569_vm0, %v568_v1  ;;  %v131_v6 = vld [vmem:[%s797_s3 + $0x68] sm:$0xff]  ;;  %v130_v7 = vld [vmem:[%s797_s3 + $0x60] sm:$0xff] }
   0x7   :  { %464 = vmatprep.subr.mxu1 %v568_v1  ;;  %v129_v8 = vld [vmem:[%s797_s3 + $0x58] sm:$0xff]  ;;  %v128_v9 = vld [vmem:[%s797_s3 + $0x50] sm:$0xff]  ;;  %v127_v10 = vld [vmem:[%s797_s3 + $0x48] sm:$0xff] }
   0x8   :  { %465 = vmatpush3.msra.mxu1 %v132_v5  ;;  %v126_v11 = vld [vmem:[%s797_s3 + $0x40] sm:$0xff]  ;;  %v125_v12 = vld [vmem:[%s797_s3 + $0x38] sm:$0xff]  ;;  %v124_v13 = vld [vmem:[%s797_s3 + $0x30] sm:$0xff] }
   0x9   :  { %466 = vmatprep.subr.mxu1 %v568_v1  ;;  %v123_v14 = vld [vmem:[%s797_s3 + $0x28] sm:$0xff]  ;;  %v122_v15 = vld [vmem:[%s797_s3 + $0x20] sm:$0xff]  ;;  %v121_v16 = vld [vmem:[%s797_s3 + $0x18] sm:$0xff] }
   0xa   :  { %467 = vmatpush3.msra.mxu1 %v131_v6  ;;  %v120_v17 = vld [vmem:[%s797_s3 + $0x10] sm:$0xff]  ;;  %v119_v18 = vld [vmem:[%s797_s3 + $0x8] sm:$0xff]  ;;  %v118_v19 = vld [vmem:[%s797_s3] sm:$0xff] }
   0xb   :  { %468 = vmatprep.subr.mxu1 %v568_v1  ;;  %v409_v20 = vld [vmem:[%s796_s2] ss:$0 sm:$0xff]  ;;  %v213_v25 = vld [vmem:[%s799_s5 + $0x8] sm:$0xff]  ;;  %v310_v32 = vld [vmem:[%s801_s7 + $0x78] sm:$0xff] }
   0xc   :  { %469 = vmatpush3.msra.mxu1 %v130_v7  ;;  %498 = vmatpush3.msra.mxu0 %v213_v25  ;;  %v212_v26 = vld [vmem:[%s799_s5] sm:$0xff]  ;;  %v309_v33 = vld [vmem:[%s801_s7 + $0x70] sm:$0xff]  ;;  %v308_v34 = vld [vmem:[%s801_s7 + $0x68] sm:$0xff] }
   0xd   :  { %470 = vmatprep.subr.mxu1 %v568_v1  ;;  %499 = vmatprep.subr.mxu0 %v568_v1  ;;  %v411_v27 = vld [vmem:[%s798_s4] ss:$0 sm:$0xff]  ;;  %v306_v36 = vld [vmem:[%s801_s7 + $0x58] sm:$0xff]  ;;  %v305_v37 = vld [vmem:[%s801_s7 + $0x50] sm:$0xff] }
   0xe   :  { %471 = vmatpush3.msra.mxu1 %v129_v8  ;;  %500 = vmatpush3.msra.mxu0 %v212_v26  ;;  %v307_v35 = vld [vmem:[%s801_s7 + $0x60] sm:$0xff]  ;;  %v304_v38 = vld [vmem:[%s801_s7 + $0x48] sm:$0xff]  ;;  %v302_v40 = vld [vmem:[%s801_s7 + $0x38] sm:$0xff] }
   0xf   :  { %472 = vmatprep.subr.mxu1 %v568_v1  ;;  %504 = vmatprep.subr.mxu0 %v568_v1  ;;  %v303_v39 = vld [vmem:[%s801_s7 + $0x40] sm:$0xff]  ;;  %v301_v41 = vld [vmem:[%s801_s7 + $0x30] sm:$0xff]  ;;  %v300_v42 = vld [vmem:[%s801_s7 + $0x28] sm:$0xff] }
  0x10   :  { %473 = vmatpush3.msra.mxu1 %v128_v9  ;;  %v299_v43 = vld [vmem:[%s801_s7 + $0x20] sm:$0xff]  ;;  %v298_v44 = vld [vmem:[%s801_s7 + $0x18] sm:$0xff]  ;;  %v297_v45 = vld [vmem:[%s801_s7 + $0x10] sm:$0xff] }
  0x11   :  { %474 = vmatprep.subr.mxu1 %v568_v1  ;;  %v296_v46 = vld [vmem:[%s801_s7 + $0x8] sm:$0xff]  ;;  %v295_v47 = vld [vmem:[%s801_s7] sm:$0xff]  ;;  %s570_s7 = smov [#allocation2]  }
  0x12   :  { %475 = vmatpush3.msra.mxu1 %v127_v10  ;;  %v412_v48 = vld [vmem:[%s800_s6] ss:$0 sm:$0xff]  ;;  %s401_s6 = sshll.u32 %s570_s7, 4  ;;  %s402_s6 = int_to_ptr.vmem [resolvable:$true] %s401_s6 }
  0x13   :  { %476 = vmatprep.subr.mxu1 %v568_v1  ;;  %v414_v53 = vld [vmem:[%s802_s8] ss:$0 sm:$0xff]  ;;  %s546_s14 = scalar_lea.vmem %s402_s6, 128  ;;  %p551_p1 = scmp.lt.s32.totalorder %s402_s6, %s402_s6 }
  0x14   :  { %477 = vmatpush3.msra.mxu1 %v126_v11  ;;  %p547_p0 = scmp.ne.s32.totalorder %s402_s6, %s546_s14  ;;  %p552_p2 = scmp.lt.s32.totalorder %s546_s14, %s546_s14 }
  0x15   :  { %478 = vmatprep.subr.mxu1 %v568_v1 }
  0x16   :  { %479 = vmatpush3.msra.mxu1 %v125_v12  ;;  %p553_p3 = por %p552_p2, %p551_p1 }
  0x17   :  { %480 = vmatprep.subr.mxu1 %v568_v1 }
  0x18   :  { %481 = vmatpush3.msra.mxu1 %v124_v13  ;;  %p554_p4 = pnand %p553_p3, %p547_p0 }
  0x19   :  { %482 = vmatprep.subr.mxu1 %v568_v1 }
  0x1a   :  { %483 = vmatpush3.msra.mxu1 %v123_v14 }
  0x1b   :  { %484 = vmatprep.subr.mxu1 %v568_v1 }
  0x1c   :  { %485 = vmatpush3.msra.mxu1 %v122_v15 }
  0x1d   :  { %486 = vmatprep.subr.mxu1 %v568_v1 }
  0x1e   :  { %487 = vmatpush3.msra.mxu1 %v121_v16 }
  0x1f   :  { %488 = vmatprep.subr.mxu1 %v568_v1 }
  0x20   :  { %489 = vmatpush3.msra.mxu1 %v120_v17 }
  0x21   :  { %490 = vmatprep.subr.mxu1 %v568_v1 }
  0x22   :  { %491 = vmatpush3.msra.mxu1 %v119_v18 }
  0x23   :  { %492 = vmatprep.subr.mxu1 %v568_v1 }
  0x24   :  { %493 = vmatpush3.msra.mxu1 %v118_v19 }
  0xc5   :  { %v113_v21 = vpop.f32.mrf.mxu1 }
  0xc6   :  { %v114_v22 = vadd.f32 %v409_v20, %v113_v21 }
  0xc7   :  { %v461_v23 = vpop.f32.mrf.mxu1 }
  0xc8   :  { %v117_v24 = vmax.f32 %v114_v22, 0.0 }
  0xca   :  { %495 = vmatmul.mubr.f32.vlgmr.msra.gmra.mxu1 %v117_v24 }
 0x18a   :  { %v207_v28 = vpop.f32.mrf.mxu1 }
 0x18b   :  { %v208_v29 = vadd.f32 %v411_v27, %v207_v28 }
 0x18c   :  { %v496_v30 = vpop.f32.mrf.mxu1 }
 0x18d   :  { %v211_v31 = vmax.f32 %v208_v29, 0.0 }
 0x18f   :  { %502 = vmatmul.mubr.msk.f32.vlgmr.msra.gmra.mxu0 %vm43_vm1, %v211_v31 }
 0x190   :  { %505 = vmatpush3.msra.mxu0 %v310_v32  ;;  %536 = vmatprep.mubr.msk.f32.mxu0 %vm569_vm0, %v568_v1 }
 0x191   :  { %506 = vmatprep.subr.mxu0 %v568_v1 }
 0x192   :  { %507 = vmatpush3.msra.mxu0 %v309_v33 }
 0x193   :  { %508 = vmatprep.subr.mxu0 %v568_v1 }
 0x194   :  { %509 = vmatpush3.msra.mxu0 %v308_v34 }
 0x195   :  { %510 = vmatprep.subr.mxu0 %v568_v1 }
 0x196   :  { %511 = vmatpush3.msra.mxu0 %v307_v35 }
 0x197   :  { %512 = vmatprep.subr.mxu0 %v568_v1 }
 0x198   :  { %513 = vmatpush3.msra.mxu0 %v306_v36 }
 0x199   :  { %514 = vmatprep.subr.mxu0 %v568_v1 }
 0x19a   :  { %515 = vmatpush3.msra.mxu0 %v305_v37 }
 0x19b   :  { %516 = vmatprep.subr.mxu0 %v568_v1 }
 0x19c   :  { %517 = vmatpush3.msra.mxu0 %v304_v38 }
 0x19d   :  { %518 = vmatprep.subr.mxu0 %v568_v1 }
 0x19e   :  { %519 = vmatpush3.msra.mxu0 %v303_v39 }
 0x19f   :  { %520 = vmatprep.subr.mxu0 %v568_v1 }
 0x1a0   :  { %521 = vmatpush3.msra.mxu0 %v302_v40 }
 0x1a1   :  { %522 = vmatprep.subr.mxu0 %v568_v1 }
 0x1a2   :  { %523 = vmatpush3.msra.mxu0 %v301_v41 }
 0x1a3   :  { %524 = vmatprep.subr.mxu0 %v568_v1 }
 0x1a4   :  { %525 = vmatpush3.msra.mxu0 %v300_v42 }
 0x1a5   :  { %526 = vmatprep.subr.mxu0 %v568_v1 }
 0x1a6   :  { %527 = vmatpush3.msra.mxu0 %v299_v43 }
 0x1a7   :  { %528 = vmatprep.subr.mxu0 %v568_v1 }
 0x1a8   :  { %529 = vmatpush3.msra.mxu0 %v298_v44 }
 0x1a9   :  { %530 = vmatprep.subr.mxu0 %v568_v1 }
 0x1aa   :  { %531 = vmatpush3.msra.mxu0 %v297_v45 }
 0x1ab   :  { %532 = vmatprep.subr.mxu0 %v568_v1 }
 0x1ac   :  { %533 = vmatpush3.msra.mxu0 %v296_v46 }
 0x1ad   :  { %534 = vmatprep.subr.mxu0 %v568_v1 }
 0x1ae   :  { %535 = vmatpush3.msra.mxu0 %v295_v47 }
 0x24f   :  { %v290_v49 = vpop.f32.mrf.mxu0 }
 0x250   :  { %v291_v50 = vadd.f32 %v412_v48, %v290_v49 }
 0x251   :  { %v503_v51 = vpop.f32.mrf.mxu0 }
 0x252   :  { %v294_v52 = vmax.f32 %v291_v50, 0.0 }
 0x254   :  { %537 = vmatmul.mubr.f32.vlgmr.msra.gmra.mxu0 %v294_v52 }
 0x314   :  { %v384_v54 = vpop.f32.mrf.mxu0 }
 0x315   :  { %v385_v55 = vadd.f32 %v414_v53, %v384_v54 }
 0x316   :  { %v538_v56 = vpop.f32.mrf.mxu0 }
 0x317   :  { %v388_v57 = vsub.f32 0.0, %v385_v55 }
 0x319   :  { %v389_v58 = vmul.f32 1.442695, %v388_v57 }
 0x31b   :  { %542 = vpow2.f32 %v389_v58 }
 0x328   :  { %v543_v59 = vpop.eup %542 }
 0x329   :  { %v391_v60 = vadd.f32 1.0, %v543_v59 }
 0x32b   :  { %544 = vrcp.f32 %v391_v60 }
 0x338   :  { %v545_v61 = vpop.eup %544 }
 0x339   :  { %394 = vst.msk [vmem:[#allocation2] sm:$0xff] %vm43_vm1, %v545_v61 }
 0x33a   :  { %557 = shalt.err (!%p554_p4)
}
 0x33b   :  { %404 = dma.vmem_to_hbm [thread:$0]  %s402_s6, 128, %s803_s9, [#allocation3]  }
 0x33c   :  { %566 = dma.done.wait [#allocation3], 128  }
 0x33d   :  { %567 = vsyncadd [#allocation3], 4294967168 }
 0x33e   :  { %408 = vsyncpa [#allocation3], 1 }

</bundles_post_ra>
